<compile_context>
chip_gen: v5e
topology: v5e:2x2
jax: 0.10.0
libtpu: 0.0.40
codegen_flags: <defaults>
</compile_context>

<pallas_src>
import functools

import jax
import jax.numpy as jnp
from jax import lax
from jax.experimental import pallas as pl
from jax.experimental.pallas import tpu as pltpu


# --------------------------------------------------------------------------
# Kernel
# --------------------------------------------------------------------------
def classifier_kernel(x_ref, w_ref, b_ref, o_ref, *, tk, tanh_in_f32):
    """One (batch-block, K-block) grid step.

    x_ref: (TB, TK) bf16  pre-tanh activations (encoder epilogue fused here)
    w_ref: (C,  K)  bf16  full PyTorch-layout weight, VMEM-resident (DMA'd once)
    b_ref: (1,  C)  f32   bias
    o_ref: (TB, C)  f32   logits; resident across the K axis -> accumulator
    """
    k = pl.program_id(1)

    @pl.when(k == 0)
    def _():
        o_ref[...] = jnp.zeros_like(o_ref)

    # Fused encoder epilogue: bf16 tanh on v6e/v7x (EUP handles bf16 natively,
    # keeps the kernel cleanly HBM-bound); f32 round-trip only on v5-class.
    if tanh_in_f32:
        x = jnp.tanh(x_ref[...].astype(jnp.float32)).astype(jnp.bfloat16)
    else:
        x = jnp.tanh(x_ref[...])

    # Current K window of the resident weight (128-aligned lane-axis slice).
    k_off = pl.multiple_of(k * tk, 128)
    w = w_ref[:, pl.ds(k_off, tk)]                      # (C, TK) bf16

    # Contract on axis 1 of BOTH operands so the 128-multiple K stays on the
    # lane axis (no 10 -> 128 lane padding of W or the output).  Accumulate
    # directly into the resident f32 output block.
    o_ref[...] += lax.dot_general(
        x, w,
        dimension_numbers=(((1,), (1,)), ((), ())),
        preferred_element_type=jnp.float32)

    @pl.when(k == pl.num_programs(1) - 1)
    def _():
        o_ref[...] += b_ref[...]


# --------------------------------------------------------------------------
# Wrapper helpers
# --------------------------------------------------------------------------
def _round_up(x, m):
    return (x + m - 1) // m * m


def _pick_k_tile(K, tk_max):
    """Largest 128-multiple tile <= tk_max that divides K (fallback: K)."""
    for tk in (8192, 4096, 2048, 1024, 512, 256, 128):
        if tk <= tk_max and tk <= K and K % tk == 0:
            return tk
    return K


def _pick_b_tile(B, tb_max, min_blocks):
    """Largest batch tile that divides B, is sublane-friendly, and (when
    possible) leaves >= min_blocks batch blocks for megacore sharding."""
    cands = [d for d in range(8, min(B, tb_max) + 1, 8) if B % d == 0]
    if B <= tb_max:
        cands.append(B)                  # block == full dim is always legal
    cands = sorted(set(cands), reverse=True)
    if not cands:
        return B
    for tb in cands:
        if B // tb >= min_blocks:
            return tb
    return cands[0]


def _chip_kind():
    try:
        return jax.devices()[0].device_kind.lower()
    except Exception:
        return ""


# --------------------------------------------------------------------------
# Classifier wrapper (the Pallas call)
# --------------------------------------------------------------------------
def mathnet_classifier(x_pre, w_ck, b, *, tk_max=8192, tb_max=256,
                       num_cores=None, tanh_in_f32=None):
    """Classifier head with fused tanh epilogue.

    x_pre: (B, K) bf16 pre-tanh flattened encoder output
    w_ck:  (C, K) bf16 weight in PyTorch nn.Linear layout
    b:     (C,)   f32  bias
    returns (B, C) f32 logits of tanh(x_pre) @ w_ck.T + b
    """
    B, K = x_pre.shape
    C = w_ck.shape[0]

    kind = _chip_kind()
    if num_cores is None:
        num_cores = 2 if "v7" in kind else 1        # v7x: 2 TCs per chip
    if tanh_in_f32 is None:
        # bf16 EUP/VPU only on v6e/v7x; keep the f32 path elsewhere.
        tanh_in_f32 = not ("v6" in kind or "v7" in kind)

    TK = _pick_k_tile(K, tk_max)
    TB = _pick_b_tile(B, tb_max, num_cores)
    assert K % TK == 0, "K must be divisible by the K tile"
    assert B % TB == 0, "B must be divisible by the batch tile"

    nb, nk = B // TB, K // TK
    b2 = b.reshape(1, C).astype(jnp.float32)

    # VMEM budget: double-buffered x tiles + resident W + output/bias (with
    # sublane/lane padding).  Lift v5e's 16 MiB scoped default; stay well
    # under v7x's 64 MiB physical VMEM.
    x_bytes = _round_up(TB, 16) * TK * 2                   # bf16 x tile
    w_bytes = _round_up(C, 16) * _round_up(K, 128) * 2     # bf16 resident W
    o_bytes = _round_up(TB, 8) * 128 * 4                   # f32 out + bias pad
    need = 2 * x_bytes + 2 * w_bytes + 4 * o_bytes + (2 << 20)
    vmem_limit = int(min(max(need, 32 << 20), 56 << 20))

    cost = pl.CostEstimate(
        flops=2 * B * K * C,
        transcendentals=B * K,                             # fused tanh
        bytes_accessed=2 * B * K + 2 * K * C + 4 * C + 4 * B * C,
    )

    kernel = functools.partial(classifier_kernel, tk=TK,
                               tanh_in_f32=tanh_in_f32)

    return pl.pallas_call(
        kernel,
        out_shape=jax.ShapeDtypeStruct((B, C), jnp.float32),
        grid_spec=pltpu.PrefetchScalarGridSpec(
            num_scalar_prefetch=0,
            grid=(nb, nk),
            in_specs=[
                pl.BlockSpec((TB, TK), lambda i, k: (i, k)),   # x, streamed
                pl.BlockSpec((C, K), lambda i, k: (0, 0)),     # W, VMEM-resident
                pl.BlockSpec((1, C), lambda i, k: (0, 0)),     # bias
            ],
            out_specs=pl.BlockSpec((TB, C), lambda i, k: (i, 0)),
        ),
        compiler_params=pltpu.CompilerParams(
            # batch axis parallel (v7x 2 TCs), reduction axis arbitrary
            dimension_semantics=("parallel", "arbitrary"),
            vmem_limit_bytes=vmem_limit,
        ),
        cost_estimate=cost,
    )(x_pre, w_ck, b2)


# --------------------------------------------------------------------------
# Frozen-BERT stand-in + full forward
# --------------------------------------------------------------------------
def bert_stub_pre(sequence, emb_table, pos_table):
    # TODO(synk): the frozen external BERT encoder has no definition in the
    # module; it is replaced by a deterministic embedding + positional
    # stand-in whose tanh epilogue is fused into the Pallas classifier kernel.
    tok = jnp.take(emb_table, sequence, axis=0)             # (B, S, D)
    return tok + pos_table[None, :, :]                      # pre-tanh


def mathnet_forward(sequence, emb_table, pos_table, w_ck, b):
    # Keep the entire activation path in bf16: the (B, S, D) pre-tanh
    # activation never round-trips HBM in f32 (gather + add + reshape emit
    # bf16 directly, consumed by the kernel's DMA); tanh happens in-kernel.
    pre = bert_stub_pre(sequence,
                        emb_table.astype(jnp.bfloat16),
                        pos_table.astype(jnp.bfloat16))     # (B, S, D) bf16
    B = pre.shape[0]
    x_pre = pre.reshape(B, -1)                              # (B, K) bf16
    w_bf = w_ck.astype(jnp.bfloat16)                        # (C, K) bf16
    return mathnet_classifier(x_pre, w_bf, b)               # (B, C) f32


# --------------------------------------------------------------------------
# Smoke test
# --------------------------------------------------------------------------
if __name__ == "__main__":
    # Small shapes consistent with the forward pass.
    B, S, D, C, VOCAB = 2, 8, 32, 10, 64
    K = S * D                                               # 256

    key = jax.random.PRNGKey(0)
    k_seq, k_emb, k_pos, k_w, k_b = jax.random.split(key, 5)

    sequence = jax.random.randint(k_seq, (B, S), 0, VOCAB, dtype=jnp.int32)
    emb_table = jax.random.normal(k_emb, (VOCAB, D), dtype=jnp.float32) * 0.1
    pos_table = jax.random.normal(k_pos, (S, D), dtype=jnp.float32) * 0.1

    # nn.Linear(D*S, C): PyTorch weight stays in its native (C, K) layout.
    w_pt = jax.random.normal(k_w, (C, K), dtype=jnp.float32) * (1.0 / jnp.sqrt(K))
    b = jax.random.normal(k_b, (C,), dtype=jnp.float32) * 0.01

    # Path 1: full forward with the default (large-tile) settings; nk == 1.
    logits = mathnet_forward(sequence, emb_table, pos_table, w_pt, b)
    logits = jax.block_until_ready(logits)
    assert logits.shape == (B, C)

    # Path 2: force TK=128 at this toy K=256 so the multi-step accumulator
    # path (zero / accumulate / bias-finalize on the resident output block)
    # is exercised; production uses the default tk_max=8192.
    pre_bf = bert_stub_pre(sequence, emb_table.astype(jnp.bfloat16),
                           pos_table.astype(jnp.bfloat16))
    x_pre = pre_bf.reshape(B, -1)
    w_bf = w_pt.astype(jnp.bfloat16)
    logits2 = mathnet_classifier(x_pre, w_bf, b, tk_max=128)
    logits2 = jax.block_until_ready(logits2)
    assert logits2.shape == (B, C)

    # Bit-path reference (same bf16 quantization as the kernel; in-kernel tanh
    # may be bf16 on v6e/v7x, hence the ~ulp-level tolerance).
    x_act = jnp.tanh(x_pre.astype(jnp.float32)).astype(jnp.bfloat16)
    ref_bf = (
        lax.dot_general(x_act, w_bf,
                        dimension_numbers=(((1,), (1,)), ((), ())),
                        preferred_element_type=jnp.float32)
        + b[None, :]
    )
    assert jnp.allclose(logits2, ref_bf, atol=5e-3, rtol=5e-3)
    assert jnp.allclose(logits, ref_bf, atol=5e-3, rtol=5e-3)

    # Full-precision module reference — loose check (bf16 streaming error).
    pre_f32 = jnp.take(emb_table, sequence, axis=0) + pos_table[None, :, :]
    ref_f32 = jnp.tanh(pre_f32).reshape(B, -1) @ w_pt.T + b
    assert jnp.allclose(logits, ref_f32, atol=3e-2, rtol=3e-2)
    assert jnp.allclose(logits2, ref_f32, atol=3e-2, rtol=3e-2)

    print("KERNEL_OK")
</pallas_src>

<mosaic_0001>
module attributes {stable_mosaic.version = 11 : i64} {
  func.func @classifier_kernel(%arg0: i32, %arg1: i32, %arg2: memref<2x256xbf16, #tpu.memory_space<vmem>>, %arg3: memref<10x256xbf16, #tpu.memory_space<vmem>>, %arg4: memref<1x10xf32, #tpu.memory_space<vmem>>, %arg5: memref<2x10xf32, #tpu.memory_space<vmem>>) attributes {dimension_semantics = [#tpu.dimension_semantics<parallel>, #tpu.dimension_semantics<arbitrary>], iteration_bounds = array<i64: 1, 1>, scalar_prefetch = 0 : i64, scratch_operands = 0 : i64, tpu.core_type = #tpu.core_type<tc>, window_params = [{transform_indices = @transform_0, window_bounds = array<i64: 2, 256>}, {pipeline_mode = #tpu.pipeline_mode<synchronous>, transform_indices = @transform_1, window_bounds = array<i64: 10, 256>}, {pipeline_mode = #tpu.pipeline_mode<synchronous>, transform_indices = @transform_2, window_bounds = array<i64: 1, 10>}, {transform_indices = @transform_3, window_bounds = array<i64: 2, 10>}]} {
    %c0_i32 = arith.constant 0 : i32
    %0 = arith.cmpi eq, %arg1, %c0_i32 : i32
    %1 = arith.extui %0 : i1 to i32
    %c0_i32_0 = arith.constant 0 : i32
    %2 = arith.cmpi ne, %1, %c0_i32_0 : i32
    scf.if %2 {
      %cst_9 = arith.constant 0.000000e+00 : f32
      %18 = vector.broadcast %cst_9 : f32 to vector<2x10xf32>
      %c0_10 = arith.constant 0 : index
      %c0_11 = arith.constant 0 : index
      %19 = vector.load %arg5[%c0_10, %c0_11] : memref<2x10xf32, #tpu.memory_space<vmem>>, vector<2x10xf32>
      tpu.vector_store %arg5[%c0_10, %c0_11], %18 {strides = array<i32>} : memref<2x10xf32, #tpu.memory_space<vmem>>, vector<2x10xf32>,
    } else {
    }
    %c0 = arith.constant 0 : index
    %c0_1 = arith.constant 0 : index
    %3 = vector.load %arg2[%c0, %c0_1] : memref<2x256xbf16, #tpu.memory_space<vmem>>, vector<2x256xbf16>
    %4 = arith.extf %3 : vector<2x256xbf16> to vector<2x256xf32>
    %5 = math.tanh %4 : vector<2x256xf32>
    %6 = arith.truncf %5 : vector<2x256xf32> to vector<2x256xbf16>
    %c256_i32 = arith.constant 256 : i32
    %7 = arith.muli %arg1, %c256_i32 : i32
    %8 = tpu.assume_multiple %7, 128 : i32
    %c0_2 = arith.constant 0 : index
    %9 = arith.index_cast %8 : i32 to index
    %10 = vector.load %arg3[%c0_2, %9] : memref<10x256xbf16, #tpu.memory_space<vmem>>, vector<10x256xbf16>
    %c0_3 = arith.constant 0 : index
    %c0_4 = arith.constant 0 : index
    %11 = vector.load %arg5[%c0_3, %c0_4] : memref<2x10xf32, #tpu.memory_space<vmem>>, vector<2x10xf32>
    %cst = arith.constant dense<0.000000e+00> : vector<2x10xf32>
    %12 = tpu.matmul %6, %10, %cst {dimension_numbers = #tpu.dot_dimension_numbers<[1], [1], [0], [0], [0, 0, 1, 0], [], []>} : vector<2x256xbf16>, vector<10x256xbf16>, vector<2x10xf32> -> vector<2x10xf32>
    %13 = arith.addf %11, %12 : vector<2x10xf32>
    %c0_5 = arith.constant 0 : index
    %c0_6 = arith.constant 0 : index
    %14 = vector.load %arg5[%c0_5, %c0_6] : memref<2x10xf32, #tpu.memory_space<vmem>>, vector<2x10xf32>
    tpu.vector_store %arg5[%c0_5, %c0_6], %13 {strides = array<i32>} : memref<2x10xf32, #tpu.memory_space<vmem>>, vector<2x10xf32>,
    %c0_i32_7 = arith.constant 0 : i32
    %15 = arith.cmpi eq, %arg1, %c0_i32_7 : i32
    %16 = arith.extui %15 : i1 to i32
    %c0_i32_8 = arith.constant 0 : i32
    %17 = arith.cmpi ne, %16, %c0_i32_8 : i32
    scf.if %17 {
      %c0_9 = arith.constant 0 : index
      %c0_10 = arith.constant 0 : index
      %18 = vector.load %arg5[%c0_9, %c0_10] : memref<2x10xf32, #tpu.memory_space<vmem>>, vector<2x10xf32>
      %c0_11 = arith.constant 0 : index
      %c0_12 = arith.constant 0 : index
      %19 = vector.load %arg4[%c0_11, %c0_12] : memref<1x10xf32, #tpu.memory_space<vmem>>, vector<1x10xf32>
      %20 = vector.broadcast %19 : vector<1x10xf32> to vector<2x10xf32>
      %21 = arith.addf %18, %20 : vector<2x10xf32>
      %c0_13 = arith.constant 0 : index
      %c0_14 = arith.constant 0 : index
      %22 = vector.load %arg5[%c0_13, %c0_14] : memref<2x10xf32, #tpu.memory_space<vmem>>, vector<2x10xf32>
      tpu.vector_store %arg5[%c0_13, %c0_14], %21 {strides = array<i32>} : memref<2x10xf32, #tpu.memory_space<vmem>>, vector<2x10xf32>,
    } else {
    }
    return
  }
  func.func @transform_0(%arg0: i32, %arg1: i32) -> (i32, i32) {
    %c0_i32 = arith.constant 0 : i32
    return %arg0, %arg1 : i32, i32
  }
  func.func @transform_1(%arg0: i32, %arg1: i32) -> (i32, i32) {
    %c0_i32 = arith.constant 0 : i32
    %c0_i32_0 = arith.constant 0 : i32
    %c0_i32_1 = arith.constant 0 : i32
    return %c0_i32, %c0_i32_0 : i32, i32
  }
  func.func @transform_2(%arg0: i32, %arg1: i32) -> (i32, i32) {
    %c0_i32 = arith.constant 0 : i32
    %c0_i32_0 = arith.constant 0 : i32
    %c0_i32_1 = arith.constant 0 : i32
    return %c0_i32, %c0_i32_0 : i32, i32
  }
  func.func @transform_3(%arg0: i32, %arg1: i32) -> (i32, i32) {
    %c0_i32 = arith.constant 0 : i32
    %c0_i32_0 = arith.constant 0 : i32
    return %arg0, %c0_i32 : i32, i32
  }
}

</mosaic_0001>

<bundles_post_ra>
// kernel: tpu_custom_call.1
= control target key start
LH: loop header
LB: loop body
LE: loop exit
PB: predicated region body
PF: predicated region fallthrough
CT: control target
= control target key end

     0   :  { %8 = vsyncpa [#allocation3], 0  ;;  %s278_s0 = inlined_call_operand.hbm [shape: bf16[2,256], index: 0, kind: input, shape index: {}]   ;;  %s279_s1 = inlined_call_operand.hbm [shape: bf16[10,256], index: 1, kind: input, shape index: {}]   ;;  %s280_s2 = inlined_call_operand.vmem [shape: f32[1,10], index: 2, kind: input, shape index: {}]   ;;  %s281_s3 = inlined_call_operand.hbm [shape: f32[2,10], index: 3, kind: output, shape index: {}]  }
   0x1   :  { %9 = vsyncpa [#allocation6], 0 }
   0x2   :  { %10 = vsyncpa [#allocation4], 0  ;;  %s16_s14 = sshll.u32 %s278_s0, 4  ;;  %s237_s15 = smov [#allocation2]   ;;  %s17_s14 = int_to_ptr.hbm [resolvable:$true] %s16_s14 }
   0x3   :  { %s18_s16 = sshll.u32 %s237_s15, 4  ;;  %s26_s19 = sshll.u32 %s279_s1, 4  ;;  %s19_s16 = int_to_ptr.vmem [resolvable:$true] %s18_s16  ;;  %s27_s19 = int_to_ptr.hbm [resolvable:$true] %s26_s19 }
   0x4   :  { %21 = dma.hbm_to_vmem [thread:$0]  %s17_s14, 32, %s19_s16, [#allocation3]  }
   0x5   :  { %s238_s20 = smov [#allocation5]   ;;  %s239_s22 = smov 128  }
   0x6   :  { %s28_s21 = sshll.u32 %s238_s20, 4  ;;  %s240_s23 = smov 8   ;;  %s29_s21 = int_to_ptr.vmem [resolvable:$true] %s28_s21 }
   0x7   :  { %34 = dma.hbm_to_vmem [thread:$0]  %s27_s19, 256, %s29_s21, [#allocation6], %s239_s22, %s239_s22, %s240_s23  }
   0x8   :  { %231 = dma.done.wait [#allocation3], 32  }
   0x9   :  { %232 = vsyncadd [#allocation3], 4294967264 }
   0xa   :  { %233 = dma.done.wait [#allocation6], 256  }
   0xb   :  { %234 = vsyncadd [#allocation6], 4294967040  ;;  %v142_v0 = vld [vmem:[#allocation5] sm:$0xf]  ;;  %v149_v1 = vld [vmem:[#allocation5 + $0x4] sm:$0x10] }
   0xc   :  { %v148_v2 = vld [vmem:[#allocation5 + $0x4] sm:$0xf]  ;;  %v143_v3 = vor.u32 %v149_v1, %v142_v0  ;;  %v144_v4 = vld [vmem:[#allocation5 + $0x8] sm:$0x10]  ;;  %v52_v5 = vld [vmem:[#allocation2] sm:$0x3] }
   0xd   :  { %v147_v6 = vor.u32 %v148_v2, %v144_v4  ;;  %v53_v7 = vunpack.c.l.bf16 %v52_v5  ;;  %vm50_vm0 = vcmask 74752   ;;  %v241_v13 = vmov 0.0   ;;  %v156_v21 = vld [vmem:[%s280_s2] ss:$0 sm:$0xff]  ;;  %s242_s24 = smov [#allocation7]   ;;  %s127_s28 = sshll.u32 %s281_s3, 4  ;;  %s128_s28 = int_to_ptr.hbm [resolvable:$true] %s127_s28 }
   0xe   :  { %88 = vmatpush.bf16.xpose.msra.mxu0 %v143_v3  ;;  %51 = vst.msk [vmem:[#allocation7] sm:$0x3] %vm50_vm0, %v241_v13  ;;  %s125_s25 = sshll.u32 %s242_s24, 4  ;;  %s126_s25 = int_to_ptr.vmem [resolvable:$true] %s125_s25 }
   0xf   :  { %101 = vmatpush.bf16.xpose.msra.mxu1 %v147_v6  ;;  %157 = vtanh.f32 %v53_v7 }
  0x15   :  { %v158_v8 = vpop.eup %157  ;;  %v70_v15 = vld [vmem:[#allocation7] sm:$0x3] }
  0x16   :  { %56 = vst [vmem:[#allocation1] ss:$4 sm:$0xff] %v158_v8 }
  0x1d   :  { %v57_v9 = vld.sshfl [vmem:[#allocation1] sm:$0xff pattern:$0x73625140]  ;;  %v58_v10 = vld.sshfl [vmem:[#allocation1 + $0x8] sm:$0xff pattern:$0x73625140] }
  0x1e   :  { %v61_v11 = vpack.c.bf16 %v57_v9, %v57_v9  ;;  %v62_v12 = vpack.c.bf16 %v58_v10, %v58_v10 }
  0x20   :  { %89 = vmatmul.bf16.vlgmr.msra.gmra.mxu0 %v61_v11  ;;  %102 = vmatmul.bf16.vlgmr.msra.gmra.mxu1 %v62_v12 }
  0x9d   :  { %v90_v14 = vpop.f32.mrf.mxu0  ;;  %v103_v16 = vpop.f32.mrf.mxu1 }
  0x9e   :  { %v104_v17 = vadd.f32 %v103_v16, %v90_v14 }
  0xa0   :  { %v107_v18 = vadd.f32 %v104_v17, %v70_v15 }
  0xa2   :  { %109 = vst.msk [vmem:[#allocation7] sm:$0x3] %vm50_vm0, %v107_v18 }
  0xa5   :  { %v92_v19 = vpop.f32.mrf.mxu0  ;;  %v105_v20 = vpop.f32.mrf.mxu1 }
  0xa9   :  { %v113_v22 = vld [vmem:[#allocation7] sm:$0x3] }
  0xaa   :  { %v118_v23 = vadd.f32 %v156_v21, %v113_v22 }
  0xac   :  { %119 = vst.msk [vmem:[#allocation7] sm:$0x3] %vm50_vm0, %v118_v23 }
  0xad   :  { %130 = dma.vmem_to_hbm [thread:$0]  %s126_s25, 32, %s128_s28, [#allocation4]  }
  0xae   :  { %235 = dma.done.wait [#allocation4], 32  }
  0xaf   :  { %236 = vsyncadd [#allocation4], 4294967264 }
  0xb0   :  { %135 = vsyncpa [#allocation3], 1 }
  0xb1   :  { %136 = vsyncpa [#allocation6], 1 }
  0xb2   :  { %137 = vsyncpa [#allocation4], 1 }

</bundles_post_ra>
